<compile_context>
chip_gen: v7x
topology: tpu7x:2x2x1
jax: 0.10.0
libtpu: 0.0.40
codegen_flags: <defaults>
</compile_context>

<pallas_src>
import functools

import jax
import jax.numpy as jnp
from jax import lax
from jax.experimental import pallas as pl
from jax.experimental.pallas import tpu as pltpu


# ----------------------------------------------------------------------------
# Fused kernel: prototypes (tiny MLP + L2 norm), feature L2 norm, cosine scores,
# per-sample max value and argmax (first maximal index, like torch.max).
# ----------------------------------------------------------------------------
def _score_kernel(attr_ref, w1_ref, b1_ref, w2_ref, b2_ref, feat_ref,
                  scores_ref, maxval_ref, predidx_ref):
    # --- unseen-class prototypes (tiny; all operands VMEM-resident across the grid) ---
    h = jnp.dot(attr_ref[...], w1_ref[...],
                preferred_element_type=jnp.float32) + b1_ref[...]
    h = jnp.maximum(h, 0.0)                                            # relu(fc_s_1)
    p = jnp.dot(h, w2_ref[...],
                preferred_element_type=jnp.float32) + b2_ref[...]
    p = jnp.maximum(p, 0.0)                                            # relu(fc_s_2)  [C, D]
    p_ss = jnp.sum(p * p, axis=-1, keepdims=True)                      # [C, 1]
    proto = p * lax.rsqrt(jnp.maximum(p_ss, 1e-24))                    # row L2 normalize

    # --- feature tile (stored transposed: [D, tile_n]); column L2 normalize in f32 ---
    x = feat_ref[...].astype(jnp.float32)
    x_ss = jnp.sum(x * x, axis=0, keepdims=True)                       # [1, TN]
    xn = x * lax.rsqrt(jnp.maximum(x_ss, 1e-24))

    # --- cosine scores: canonical [C,D] x [D,TN] MXU matmul, bf16 ops / f32 accum ---
    s = jnp.dot(proto.astype(jnp.bfloat16), xn.astype(jnp.bfloat16),
                preferred_element_type=jnp.float32)                    # [C, TN] lane-dense
    scores_ref[...] = s

    # --- per-sample max / argmax over the class (sublane) axis -> lane-dense [1, TN] ---
    mx = jnp.max(s, axis=0, keepdims=True)
    maxval_ref[...] = mx
    num_c = s.shape[0]
    row = lax.broadcasted_iota(jnp.int32, s.shape, 0)
    predidx_ref[...] = jnp.min(jnp.where(s >= mx, row, jnp.int32(num_c)),
                               axis=0, keepdims=True).astype(jnp.int32)


# ----------------------------------------------------------------------------
# Wrapper
# ----------------------------------------------------------------------------
@functools.partial(jax.jit, static_argnames=("tile_n",))
def update_reliable_unseen_scores(feat_t, unseen_attr, w1, b1, w2, b2, *, tile_n=256):
    """feat_t: [D, N] transposed features (bf16 recommended).  Returns
    (scores [C, N] f32, max_val [N] f32, pred_idx [N] int32)."""
    D, N = feat_t.shape
    C, A = unseen_attr.shape
    H = w1.shape[1]
    assert w2.shape == (H, D) and b1.shape == (1, H) and b2.shape == (1, D)
    assert tile_n % 128 == 0

    n_tiles = pl.cdiv(N, tile_n)
    n_pad = n_tiles * tile_n
    if n_pad != N:  # zero-pad sample axis; padded columns are sliced away below
        feat_t = jnp.pad(feat_t, ((0, 0), (0, n_pad - N)))

    scores_t, max_val, pred_idx = pl.pallas_call(
        _score_kernel,
        out_shape=(
            jax.ShapeDtypeStruct((C, n_pad), jnp.float32),
            jax.ShapeDtypeStruct((1, n_pad), jnp.float32),
            jax.ShapeDtypeStruct((1, n_pad), jnp.int32),
        ),
        grid_spec=pltpu.PrefetchScalarGridSpec(
            num_scalar_prefetch=0,
            grid=(n_tiles,),
            in_specs=[
                pl.BlockSpec((C, A), lambda i: (0, 0)),       # unseen_attr (resident)
                pl.BlockSpec((A, H), lambda i: (0, 0)),       # w1
                pl.BlockSpec((1, H), lambda i: (0, 0)),       # b1
                pl.BlockSpec((H, D), lambda i: (0, 0)),       # w2
                pl.BlockSpec((1, D), lambda i: (0, 0)),       # b2
                pl.BlockSpec((D, tile_n), lambda i: (0, i)),  # feature tile
            ],
            out_specs=(
                pl.BlockSpec((C, tile_n), lambda i: (0, i)),  # scores.T  (lane-dense)
                pl.BlockSpec((1, tile_n), lambda i: (0, i)),  # max_val   (lane-dense)
                pl.BlockSpec((1, tile_n), lambda i: (0, i)),  # pred_idx  (lane-dense)
            ),
        ),
        compiler_params=pltpu.CompilerParams(
            dimension_semantics=("parallel",)
        ),
    )(unseen_attr, w1, b1, w2, b2, feat_t)

    return scores_t[:, :N], max_val[0, :N], pred_idx[0, :N]


def constant_filter_topk(scores_t, selected_num):
    """'constant' reliable_filter glue: per-class top-K sample indices.
    Equivalent to pre_unseen_scores.sort(dim=0, descending=True)[1][:K].reshape(-1)
    given scores_t = pre_unseen_scores.T ([C, N])."""
    _, top_idx = lax.top_k(scores_t, selected_num)      # [C, K], descending per class
    return top_idx.T.reshape(-1)                         # [K*C], matches torch layout


# ----------------------------------------------------------------------------
# Main
# ----------------------------------------------------------------------------
if __name__ == "__main__":
    # Small synthetic shapes consistent with the module's usage.
    N = 400       # number of test-unseen samples (not a multiple of tile_n -> exercises padding)
    D = 256       # visual feature dim (fc_s_2 output dim)
    A = 32        # attribute / semantic dim (fc_s_1 input dim)
    H = 64        # hidden dim of s2v_model
    C = 8         # number of unseen classes
    SELECTED = 4  # 'constant' filter top-K per class (100 in the original, scaled down)
    TILE_N = 256

    key = jax.random.PRNGKey(0)
    k_feat, k_attr, k_w1, k_b1, k_w2, k_b2 = jax.random.split(key, 6)

    # Features stored transposed [D, N] and in bf16 in HBM (one-time storage choice).
    feat_t = jax.random.normal(k_feat, (D, N), dtype=jnp.float32).astype(jnp.bfloat16)
    unseen_attr = jax.random.normal(k_attr, (C, A), dtype=jnp.float32)
    # s2v_model params (fc_s_1: A->H, fc_s_2: H->D), stored [in, out]; biases [1, out].
    w1 = jax.random.normal(k_w1, (A, H), dtype=jnp.float32) * 0.1
    b1 = jax.random.normal(k_b1, (1, H), dtype=jnp.float32) * 0.01
    w2 = jax.random.normal(k_w2, (H, D), dtype=jnp.float32) * 0.1
    b2 = jax.random.normal(k_b2, (1, D), dtype=jnp.float32) * 0.01
    unseen_class_id = jnp.arange(100, 100 + C, dtype=jnp.int32)  # global class ids

    scores_t, max_val, pred_idx = update_reliable_unseen_scores(
        feat_t, unseen_attr, w1, b1, w2, b2, tile_n=TILE_N
    )
    jax.block_until_ready((scores_t, max_val, pred_idx))

    # Glue: predicted global class id and 'constant' reliable-sample selection.
    pred_cls_id = unseen_class_id[pred_idx]
    selected_idx = constant_filter_topk(scores_t, SELECTED)           # [K*C]
    train_unseen_data_temp = feat_t.T[selected_idx]                   # selected raw samples
    outpred = jnp.tile(jnp.arange(C, dtype=jnp.int32), SELECTED)
    train_unseen_label_temp = unseen_class_id[outpred]
    # TODO(synk): accuracy bookkeeping over dynamic per-class index lists, the 'ratio'
    # filter's data-dependent-length selections, and Data_loader_Mixup_Feature dataset
    # construction are host-side Python with dynamic shapes; no Pallas equivalent.

    # ---------------- correctness checks ----------------
    HI = lax.Precision.HIGHEST

    def ref_mirror(ft, attr):
        # Mirrors the kernel's precision choices (bf16 score-matmul operands, f32 accumulate).
        p = jnp.maximum(jnp.dot(attr, w1, precision=HI) + b1, 0.0)
        p = jnp.maximum(jnp.dot(p, w2, precision=HI) + b2, 0.0)
        p = p * lax.rsqrt(jnp.maximum(jnp.sum(p * p, -1, keepdims=True), 1e-24))
        x = ft.astype(jnp.float32)
        xn = x * lax.rsqrt(jnp.maximum(jnp.sum(x * x, 0, keepdims=True), 1e-24))
        pb = p.astype(jnp.bfloat16).astype(jnp.float32)
        xb = xn.astype(jnp.bfloat16).astype(jnp.float32)
        s = jnp.dot(pb, xb, precision=HI)                              # [C, N]
        return s, s.max(axis=0)

    def ref_f32(ft, attr):
        # Pure-f32 semantics of the PyTorch hot path (on the same stored input values).
        p = jnp.maximum(jnp.dot(attr, w1, precision=HI) + b1, 0.0)
        p = jnp.maximum(jnp.dot(p, w2, precision=HI) + b2, 0.0)
        p = p / jnp.maximum(jnp.linalg.norm(p, axis=-1, keepdims=True), 1e-12)
        x = ft.astype(jnp.float32).T                                   # [N, D]
        xn = x / jnp.maximum(jnp.linalg.norm(x, axis=-1, keepdims=True), 1e-12)
        return jnp.dot(xn, p.T, precision=HI).T                        # [C, N]

    s_mir, mv_mir = ref_mirror(feat_t, unseen_attr)
    # Cosine scores live in [-1, 1]; tolerances below comfortably absorb bf16 rounding and
    # any in-kernel-vs-XLA f32-matmul precision differences while remaining meaningful.
    assert jnp.allclose(scores_t, s_mir, atol=2e-2), "scores mismatch vs mirrored ref"
    assert jnp.allclose(max_val, mv_mir, atol=2e-2), "max_val mismatch vs mirrored ref"
    # Robust argmax check: the chosen class achieves (within tolerance) the reference max.
    picked = s_mir[pred_idx, jnp.arange(N)]
    assert jnp.all(picked >= mv_mir - 2e-2), "argmax mismatch vs mirrored ref"
    # Loose check against full-f32 semantics (bf16 rounding is the only difference).
    s_f32 = ref_f32(feat_t, unseen_attr)
    assert jnp.allclose(scores_t, s_f32, atol=5e-2), "scores drifted from f32 semantics"

    jax.block_until_ready((pred_cls_id, train_unseen_data_temp, train_unseen_label_temp))
    print("KERNEL_OK")
</pallas_src>

<mosaic_0001>
module attributes {stable_mosaic.version = 11 : i64} {
  func.func @_score_kernel(%arg0: i32, %arg1: memref<8x32xf32, #tpu.memory_space<vmem>>, %arg2: memref<32x64xf32, #tpu.memory_space<vmem>>, %arg3: memref<1x64xf32, #tpu.memory_space<vmem>>, %arg4: memref<64x256xf32, #tpu.memory_space<vmem>>, %arg5: memref<1x256xf32, #tpu.memory_space<vmem>>, %arg6: memref<256x256xbf16, #tpu.memory_space<vmem>>, %arg7: memref<8x256xf32, #tpu.memory_space<vmem>>, %arg8: memref<1x256xf32, #tpu.memory_space<vmem>>, %arg9: memref<1x256xi32, #tpu.memory_space<vmem>>) attributes {dimension_semantics = [#tpu.dimension_semantics<parallel>], iteration_bounds = array<i64: 2>, scalar_prefetch = 0 : i64, scratch_operands = 0 : i64, tpu.core_type = #tpu.core_type<tc>, window_params = [{pipeline_mode = #tpu.pipeline_mode<synchronous>, transform_indices = @transform_0, window_bounds = array<i64: 8, 32>}, {pipeline_mode = #tpu.pipeline_mode<synchronous>, transform_indices = @transform_1, window_bounds = array<i64: 32, 64>}, {pipeline_mode = #tpu.pipeline_mode<synchronous>, transform_indices = @transform_2, window_bounds = array<i64: 1, 64>}, {pipeline_mode = #tpu.pipeline_mode<synchronous>, transform_indices = @transform_3, window_bounds = array<i64: 64, 256>}, {pipeline_mode = #tpu.pipeline_mode<synchronous>, transform_indices = @transform_4, window_bounds = array<i64: 1, 256>}, {transform_indices = @transform_5, window_bounds = array<i64: 256, 256>}, {transform_indices = @transform_6, window_bounds = array<i64: 8, 256>}, {transform_indices = @transform_7, window_bounds = array<i64: 1, 256>}, {transform_indices = @transform_8, window_bounds = array<i64: 1, 256>}]} {
    %c0 = arith.constant 0 : index
    %c0_0 = arith.constant 0 : index
    %0 = vector.load %arg1[%c0, %c0_0] : memref<8x32xf32, #tpu.memory_space<vmem>>, vector<8x32xf32>
    %c0_1 = arith.constant 0 : index
    %c0_2 = arith.constant 0 : index
    %1 = vector.load %arg2[%c0_1, %c0_2] : memref<32x64xf32, #tpu.memory_space<vmem>>, vector<32x64xf32>
    %cst = arith.constant dense<0.000000e+00> : vector<8x64xf32>
    %2 = tpu.matmul %0, %1, %cst {dimension_numbers = #tpu.dot_dimension_numbers<[1], [0], [0], [1], [0, 0, 1, 1], [], []>} : vector<8x32xf32>, vector<32x64xf32>, vector<8x64xf32> -> vector<8x64xf32>
    %c0_3 = arith.constant 0 : index
    %c0_4 = arith.constant 0 : index
    %3 = vector.load %arg3[%c0_3, %c0_4] : memref<1x64xf32, #tpu.memory_space<vmem>>, vector<1x64xf32>
    %4 = vector.broadcast %3 : vector<1x64xf32> to vector<8x64xf32>
    %5 = arith.addf %2, %4 : vector<8x64xf32>
    %cst_5 = arith.constant 0.000000e+00 : f32
    %6 = vector.broadcast %cst_5 : f32 to vector<8x64xf32>
    %7 = arith.maximumf %5, %6 : vector<8x64xf32>
    %c0_6 = arith.constant 0 : index
    %c0_7 = arith.constant 0 : index
    %8 = vector.load %arg4[%c0_6, %c0_7] : memref<64x256xf32, #tpu.memory_space<vmem>>, vector<64x256xf32>
    %cst_8 = arith.constant dense<0.000000e+00> : vector<8x256xf32>
    %9 = tpu.matmul %7, %8, %cst_8 {dimension_numbers = #tpu.dot_dimension_numbers<[1], [0], [0], [1], [0, 0, 1, 1], [], []>} : vector<8x64xf32>, vector<64x256xf32>, vector<8x256xf32> -> vector<8x256xf32>
    %c0_9 = arith.constant 0 : index
    %c0_10 = arith.constant 0 : index
    %10 = vector.load %arg5[%c0_9, %c0_10] : memref<1x256xf32, #tpu.memory_space<vmem>>, vector<1x256xf32>
    %11 = vector.broadcast %10 : vector<1x256xf32> to vector<8x256xf32>
    %12 = arith.addf %9, %11 : vector<8x256xf32>
    %cst_11 = arith.constant 0.000000e+00 : f32
    %13 = vector.broadcast %cst_11 : f32 to vector<8x256xf32>
    %14 = arith.maximumf %12, %13 : vector<8x256xf32>
    %15 = arith.mulf %14, %14 : vector<8x256xf32>
    %cst_12 = arith.constant dense<0.000000e+00> : vector<8xf32>
    %16 = vector.multi_reduction <add>, %15, %cst_12 [1] : vector<8x256xf32> to vector<8xf32>
    %17 = vector.shape_cast %16 : vector<8xf32> to vector<8x1xf32>
    %cst_13 = arith.constant 1.000000e-24 : f32
    %18 = vector.broadcast %cst_13 : f32 to vector<8x1xf32>
    %19 = arith.maximumf %17, %18 : vector<8x1xf32>
    %20 = math.rsqrt %19 : vector<8x1xf32>
    %21 = vector.broadcast %20 : vector<8x1xf32> to vector<8x256xf32>
    %22 = arith.mulf %14, %21 : vector<8x256xf32>
    %c0_14 = arith.constant 0 : index
    %c0_15 = arith.constant 0 : index
    %23 = vector.load %arg6[%c0_14, %c0_15] : memref<256x256xbf16, #tpu.memory_space<vmem>>, vector<256x256xbf16>
    %24 = arith.extf %23 : vector<256x256xbf16> to vector<256x256xf32>
    %25 = arith.mulf %24, %24 : vector<256x256xf32>
    %cst_16 = arith.constant dense<0.000000e+00> : vector<256xf32>
    %26 = vector.multi_reduction <add>, %25, %cst_16 [0] : vector<256x256xf32> to vector<256xf32>
    %27 = vector.shape_cast %26 : vector<256xf32> to vector<1x256xf32>
    %cst_17 = arith.constant 1.000000e-24 : f32
    %28 = vector.broadcast %cst_17 : f32 to vector<1x256xf32>
    %29 = arith.maximumf %27, %28 : vector<1x256xf32>
    %30 = math.rsqrt %29 : vector<1x256xf32>
    %31 = vector.broadcast %30 : vector<1x256xf32> to vector<256x256xf32>
    %32 = arith.mulf %24, %31 : vector<256x256xf32>
    %33 = arith.truncf %22 : vector<8x256xf32> to vector<8x256xbf16>
    %34 = arith.truncf %32 : vector<256x256xf32> to vector<256x256xbf16>
    %cst_18 = arith.constant dense<0.000000e+00> : vector<8x256xf32>
    %35 = tpu.matmul %33, %34, %cst_18 {dimension_numbers = #tpu.dot_dimension_numbers<[1], [0], [0], [1], [0, 0, 1, 1], [], []>} : vector<8x256xbf16>, vector<256x256xbf16>, vector<8x256xf32> -> vector<8x256xf32>
    %c0_19 = arith.constant 0 : index
    %c0_20 = arith.constant 0 : index
    %36 = vector.load %arg7[%c0_19, %c0_20] : memref<8x256xf32, #tpu.memory_space<vmem>>, vector<8x256xf32>
    tpu.vector_store %arg7[%c0_19, %c0_20], %35 {strides = array<i32>} : memref<8x256xf32, #tpu.memory_space<vmem>>, vector<8x256xf32>,
    %cst_21 = arith.constant dense<0xFF800000> : vector<256xf32>
    %37 = vector.multi_reduction <maximumf>, %35, %cst_21 [0] : vector<8x256xf32> to vector<256xf32>
    %38 = vector.shape_cast %37 : vector<256xf32> to vector<1x256xf32>
    %c0_22 = arith.constant 0 : index
    %c0_23 = arith.constant 0 : index
    %39 = vector.load %arg8[%c0_22, %c0_23] : memref<1x256xf32, #tpu.memory_space<vmem>>, vector<1x256xf32>
    tpu.vector_store %arg8[%c0_22, %c0_23], %38 {strides = array<i32>} : memref<1x256xf32, #tpu.memory_space<vmem>>, vector<1x256xf32>,
    %40 = tpu.iota {dimensions = array<i32: 0>} : vector<8x256xi32>
    %41 = vector.broadcast %38 : vector<1x256xf32> to vector<8x256xf32>
    %42 = arith.cmpf oge, %35, %41 : vector<8x256xf32>
    %c8_i32 = arith.constant 8 : i32
    %43 = vector.broadcast %c8_i32 : i32 to vector<8x256xi32>
    %44 = arith.select %42, %40, %43 : vector<8x256xi1>, vector<8x256xi32>
    %cst_24 = arith.constant dense<2147483647> : vector<256xi32>
    %45 = vector.multi_reduction <minsi>, %44, %cst_24 [0] : vector<8x256xi32> to vector<256xi32>
    %46 = vector.shape_cast %45 : vector<256xi32> to vector<1x256xi32>
    %c0_25 = arith.constant 0 : index
    %c0_26 = arith.constant 0 : index
    %47 = vector.load %arg9[%c0_25, %c0_26] : memref<1x256xi32, #tpu.memory_space<vmem>>, vector<1x256xi32>
    tpu.vector_store %arg9[%c0_25, %c0_26], %46 {strides = array<i32>} : memref<1x256xi32, #tpu.memory_space<vmem>>, vector<1x256xi32>,
    return
  }
  func.func @transform_0(%arg0: i32) -> (i32, i32) {
    %c0_i32 = arith.constant 0 : i32
    %c0_i32_0 = arith.constant 0 : i32
    %c0_i32_1 = arith.constant 0 : i32
    return %c0_i32, %c0_i32_0 : i32, i32
  }
  func.func @transform_1(%arg0: i32) -> (i32, i32) {
    %c0_i32 = arith.constant 0 : i32
    %c0_i32_0 = arith.constant 0 : i32
    %c0_i32_1 = arith.constant 0 : i32
    return %c0_i32, %c0_i32_0 : i32, i32
  }
  func.func @transform_2(%arg0: i32) -> (i32, i32) {
    %c0_i32 = arith.constant 0 : i32
    %c0_i32_0 = arith.constant 0 : i32
    %c0_i32_1 = arith.constant 0 : i32
    return %c0_i32, %c0_i32_0 : i32, i32
  }
  func.func @transform_3(%arg0: i32) -> (i32, i32) {
    %c0_i32 = arith.constant 0 : i32
    %c0_i32_0 = arith.constant 0 : i32
    %c0_i32_1 = arith.constant 0 : i32
    return %c0_i32, %c0_i32_0 : i32, i32
  }
  func.func @transform_4(%arg0: i32) -> (i32, i32) {
    %c0_i32 = arith.constant 0 : i32
    %c0_i32_0 = arith.constant 0 : i32
    %c0_i32_1 = arith.constant 0 : i32
    return %c0_i32, %c0_i32_0 : i32, i32
  }
  func.func @transform_5(%arg0: i32) -> (i32, i32) {
    %c0_i32 = arith.constant 0 : i32
    %c0_i32_0 = arith.constant 0 : i32
    return %c0_i32, %arg0 : i32, i32
  }
  func.func @transform_6(%arg0: i32) -> (i32, i32) {
    %c0_i32 = arith.constant 0 : i32
    %c0_i32_0 = arith.constant 0 : i32
    return %c0_i32, %arg0 : i32, i32
  }
  func.func @transform_7(%arg0: i32) -> (i32, i32) {
    %c0_i32 = arith.constant 0 : i32
    %c0_i32_0 = arith.constant 0 : i32
    return %c0_i32, %arg0 : i32, i32
  }
  func.func @transform_8(%arg0: i32) -> (i32, i32) {
    %c0_i32 = arith.constant 0 : i32
    %c0_i32_0 = arith.constant 0 : i32
    return %c0_i32, %arg0 : i32, i32
  }
}

</mosaic_0001>

<bundles_post_ra>
// kernel: update_reliable_unseen_scores.1
= control target key start
LH: loop header
LB: loop body
LE: loop exit
PB: predicated region body
PF: predicated region fallthrough
CT: control target
= control target key end

     0   :  { %14 = vsyncpa [#allocation4], 0  ;;  %s2448_s0 = inlined_call_operand.vmem [shape: f32[8,32], index: 0, kind: input, shape index: {}]   ;;  %s2449_s1 = inlined_call_operand.vmem [shape: f32[32,64], index: 1, kind: input, shape index: {}]   ;;  %s2450_s2 = inlined_call_operand.vmem [shape: f32[1,64], index: 2, kind: input, shape index: {}]   ;;  %s2451_s3 = inlined_call_operand.vmem [shape: f32[64,256], index: 3, kind: input, shape index: {}]   ;;  %s2452_s4 = inlined_call_operand.vmem [shape: f32[1,256], index: 4, kind: input, shape index: {}]   ;;  %s2453_s5 = inlined_call_operand.vmem [shape: bf16[256,512], index: 5, kind: input, shape index: {}]   ;;  %s2454_s6 = inlined_call_operand.hbm [shape: f32[8,512], index: 6, kind: output, shape index: {0}]   ;;  %s2455_s7 = inlined_call_operand.hbm [shape: f32[1,512], index: 7, kind: output, shape index: {1}]   ;;  %s2456_s8 = inlined_call_operand.hbm [shape: s32[1,512], index: 8, kind: output, shape index: {2}]  }
   0x1   :  { %16 = vsyncpa [#allocation4 + $0x1], 0 }
   0x2   :  { %17 = vsyncpa [#allocation6], 0 }
   0x3   :  { %19 = vsyncpa [#allocation6 + $0x1], 0  ;;  %s1670_s27 = smov 0   ;;  %s1672_s28 = smov 0  }
   0x4   :  { %s1674_s29 = smov 0   ;;  %s1676_s30 = smov 0  }
   0x5 LB: > { %s1691_s9 = sadd.s32 4294967295, %s1615_s30   ;;  %s2458_s10 = sadd.s32 4294967294, %s1615_s30   ;;  %s1615_s30 = sphi %s1676_s30, %s2520_s30   ;;  %s1611_s29 = sphi %s1674_s29, %s2519_s29   ;;  %s1607_s28 = sphi %s1672_s28, %s2518_s28   ;;  %s1603_s27 = sphi %s1670_s27, %s2517_s27  }
   0x6   : > { %s1695_s11 = sadd.s32 1, %s1615_s30   ;;  %s137_s12 = sadd.s32 1, %s1611_s29 }
   0x7   : > { %s134_s13 = ssub.s32 %s1615_s30, %s1695_s11  ;;  %p144_p0 = scmp.ne.s32.totalorder %s1611_s29, %s1607_s28 }
   0x8   : > { %p135_p1 = scmp.eq.s32.totalorder %s134_s13, 0  ;;  %p145_p2 = scmp.eq.s32.totalorder %s1615_s30, 0 }
   0x9   : > { %p174_p3 = scmp.eq.s32.totalorder %s1691_s9, 1  ;;  %p179_p4 = scmp.ne.s32.totalorder %s1607_s28, %s1603_s27 }
   0xa   : > { %s1707_s14 = scalar_select %p135_p1, %s1611_s29, %s137_s12  }
   0xb   : > { %p146_p5 = por %p145_p2, %p144_p0  ;;  %p1709_p6 = por %p174_p3, %p144_p0 }
   0xc   : > { %p180_p7 = scmp.eq.s32.totalorder %s2458_s10, 1  ;;  %p1321_p9 = scmp.ge.s32.totalorder %s1615_s30, 2 }
   0xe   : > { %p1715_p8 = por %p180_p7, %p179_p4  ;;  %263 = sbr.rel (%p1321_p9) target bundleno = 41 (0x29), region = 36 }
  0x15   : > { %266 = sbr.rel (!%p146_p5) target bundleno = 41 (0x29), region = 40  ;;  %s268_s17 = sand.u32 (%p146_p5), 1, %s1611_s29  }
  0x16   : > { %s1344_s18 = sshll.u32 (%p146_p5), %s1615_s30, 3  ;;  %s1322_s19 = sshll.u32 (%p146_p5), %s268_s17, 8 }
  0x17   : > { %s1727_s22 = scalar_lea.vmem (%p146_p5), %s2453_s5, %s1344_s18  ;;  %s1732_s23 = scalar_lea.vmem (%p146_p5), [#allocation2], %s1322_s19 }
  0x18   : > { %v363_v0 = vld [vmem:[%s1727_s22] sm:$0xff] (%p146_p5)  ;;  %v365_v1 = vld [vmem:[%s1727_s22 + $0x10] sm:$0xff] (%p146_p5) }
  0x19   : > { %v367_v2 = vld [vmem:[%s1727_s22 + $0x20] sm:$0xff] (%p146_p5)  ;;  %364 = vst [vmem:[%s1732_s23] sm:$0xff] (%p146_p5), %v363_v0  ;;  %366 = vst [vmem:[%s1732_s23 + $0x8] sm:$0xff] (%p146_p5), %v365_v1  ;;  %v369_v3 = vld [vmem:[%s1727_s22 + $0x30] sm:$0xff] (%p146_p5) }
  0x1a   : > { %368 = vst [vmem:[%s1732_s23 + $0x10] sm:$0xff] (%p146_p5), %v367_v2  ;;  %v371_v4 = vld [vmem:[%s1727_s22 + $0x40] sm:$0xff] (%p146_p5)  ;;  %v373_v5 = vld [vmem:[%s1727_s22 + $0x50] sm:$0xff] (%p146_p5)  ;;  %370 = vst [vmem:[%s1732_s23 + $0x18] sm:$0xff] (%p146_p5), %v369_v3 }
  0x1b   : > { %372 = vst [vmem:[%s1732_s23 + $0x20] sm:$0xff] (%p146_p5), %v371_v4  ;;  %374 = vst [vmem:[%s1732_s23 + $0x28] sm:$0xff] (%p146_p5), %v373_v5  ;;  %v375_v6 = vld [vmem:[%s1727_s22 + $0x60] sm:$0xff] (%p146_p5)  ;;  %v377_v7 = vld [vmem:[%s1727_s22 + $0x70] sm:$0xff] (%p146_p5) }
  0x1c   : > { %v379_v8 = vld [vmem:[%s1727_s22 + $0x80] sm:$0xff]  ;;  %376 = vst [vmem:[%s1732_s23 + $0x30] sm:$0xff] %v375_v6  ;;  %378 = vst [vmem:[%s1732_s23 + $0x38] sm:$0xff] %v377_v7  ;;  %v381_v9 = vld [vmem:[%s1727_s22 + $0x90] sm:$0xff] }
  0x1d   : > { %380 = vst [vmem:[%s1732_s23 + $0x40] sm:$0xff] %v379_v8  ;;  %v383_v10 = vld [vmem:[%s1727_s22 + $0xa0] sm:$0xff]  ;;  %v385_v11 = vld [vmem:[%s1727_s22 + $0xb0] sm:$0xff]  ;;  %382 = vst [vmem:[%s1732_s23 + $0x48] sm:$0xff] %v381_v9 }
  0x1e   : > { %384 = vst [vmem:[%s1732_s23 + $0x50] sm:$0xff] %v383_v10  ;;  %386 = vst [vmem:[%s1732_s23 + $0x58] sm:$0xff] %v385_v11  ;;  %v387_v12 = vld [vmem:[%s1727_s22 + $0xc0] sm:$0xff]  ;;  %v389_v13 = vld [vmem:[%s1727_s22 + $0xd0] sm:$0xff] }
  0x1f   : > { %v391_v14 = vld [vmem:[%s1727_s22 + $0xe0] sm:$0xff]  ;;  %388 = vst [vmem:[%s1732_s23 + $0x60] sm:$0xff] %v387_v12  ;;  %390 = vst [vmem:[%s1732_s23 + $0x68] sm:$0xff] %v389_v13  ;;  %v393_v15 = vld [vmem:[%s1727_s22 + $0xf0] sm:$0xff] }
  0x20   : > { %392 = vst [vmem:[%s1732_s23 + $0x70] sm:$0xff] %v391_v14  ;;  %v395_v16 = vld [vmem:[%s1727_s22 + $0x100] sm:$0xff]  ;;  %v397_v17 = vld [vmem:[%s1727_s22 + $0x110] sm:$0xff]  ;;  %394 = vst [vmem:[%s1732_s23 + $0x78] sm:$0xff] %v393_v15 }
  0x21   : > { %396 = vst [vmem:[%s1732_s23 + $0x80] sm:$0xff] %v395_v16  ;;  %398 = vst [vmem:[%s1732_s23 + $0x88] sm:$0xff] %v397_v17  ;;  %v399_v18 = vld [vmem:[%s1727_s22 + $0x120] sm:$0xff]  ;;  %v401_v19 = vld [vmem:[%s1727_s22 + $0x130] sm:$0xff] }
  0x22   : > { %v403_v20 = vld [vmem:[%s1727_s22 + $0x140] sm:$0xff]  ;;  %400 = vst [vmem:[%s1732_s23 + $0x90] sm:$0xff] %v399_v18  ;;  %402 = vst [vmem:[%s1732_s23 + $0x98] sm:$0xff] %v401_v19  ;;  %v405_v21 = vld [vmem:[%s1727_s22 + $0x150] sm:$0xff] }
  0x23   : > { %404 = vst [vmem:[%s1732_s23 + $0xa0] sm:$0xff] %v403_v20  ;;  %v407_v22 = vld [vmem:[%s1727_s22 + $0x160] sm:$0xff]  ;;  %v409_v23 = vld [vmem:[%s1727_s22 + $0x170] sm:$0xff]  ;;  %406 = vst [vmem:[%s1732_s23 + $0xa8] sm:$0xff] %v405_v21 }
  0x24   : > { %408 = vst [vmem:[%s1732_s23 + $0xb0] sm:$0xff] %v407_v22  ;;  %410 = vst [vmem:[%s1732_s23 + $0xb8] sm:$0xff] %v409_v23  ;;  %v411_v24 = vld [vmem:[%s1727_s22 + $0x180] sm:$0xff]  ;;  %v413_v25 = vld [vmem:[%s1727_s22 + $0x190] sm:$0xff] }
  0x25   : > { %v415_v26 = vld [vmem:[%s1727_s22 + $0x1a0] sm:$0xff]  ;;  %412 = vst [vmem:[%s1732_s23 + $0xc0] sm:$0xff] %v411_v24  ;;  %414 = vst [vmem:[%s1732_s23 + $0xc8] sm:$0xff] %v413_v25  ;;  %v417_v27 = vld [vmem:[%s1727_s22 + $0x1b0] sm:$0xff] }
  0x26   : > { %416 = vst [vmem:[%s1732_s23 + $0xd0] sm:$0xff] %v415_v26  ;;  %v419_v28 = vld [vmem:[%s1727_s22 + $0x1c0] sm:$0xff]  ;;  %v421_v29 = vld [vmem:[%s1727_s22 + $0x1d0] sm:$0xff]  ;;  %418 = vst [vmem:[%s1732_s23 + $0xd8] sm:$0xff] %v417_v27 }
  0x27   : > { %420 = vst [vmem:[%s1732_s23 + $0xe0] sm:$0xff] %v419_v28  ;;  %422 = vst [vmem:[%s1732_s23 + $0xe8] sm:$0xff] %v421_v29  ;;  %v423_v30 = vld [vmem:[%s1727_s22 + $0x1e0] sm:$0xff]  ;;  %v425_v31 = vld [vmem:[%s1727_s22 + $0x1f0] sm:$0xff] }
  0x28   : > { %424 = vst [vmem:[%s1732_s23 + $0xf0] sm:$0xff] %v423_v30  ;;  %426 = vst [vmem:[%s1732_s23 + $0xf8] sm:$0xff] %v425_v31 }
  0x29 PF: > { %p1325_p10 = scmp.ge.s32.totalorder %s1615_s30, 1  ;;  %p431_p11 = scmp.lt.s32.totalorder %s1615_s30, 3 }
  0x2b   : > { %p432_p12 = pnand %p1325_p10, %p431_p11 }
  0x2c   : > { %v486_v32 = vld [vmem:[%s2449_s1] sm:$0xff] (!%p432_p12)  ;;  %v487_v33 = vld [vmem:[%s2449_s1 + $0x8] sm:$0xff] (!%p432_p12)  ;;  %v488_v34 = vld [vmem:[%s2449_s1 + $0x10] sm:$0xff] (!%p432_p12)  ;;  %v1617_v35 = vmov (!%p432_p12), 0.0|0.0   ;;  %vm1618_vm0 = vmmov (!%p432_p12), 0   ;;  %v1619_v38 = vmov (!%p432_p12), 0.0  }
  0x2d   : > { %435 = sbr.rel (%p432_p12) target bundleno = 933 (0x3a5), region = 78  ;;  %1364 = vmatprep.subr.bf16.mxu1 (!%p432_p12), %v1617_v35  ;;  %v1365_v36 = vpack.c.bf16 (!%p432_p12), %v487_v33, %v486_v32  ;;  %v489_v37 = vld [vmem:[%s2449_s1 + $0x18] sm:$0xff] (!%p432_p12)  ;;  %1361 = vmatprep.mubr.msk.f32.mxu1 (!%p432_p12), %vm1618_vm0, %v1619_v38  ;;  %v573_v39 = vld [vmem:[%s2451_s3 + $0x8] sm:$0xff] (!%p432_p12)  ;;  %v572_v43 = vld [vmem:[%s2451_s3] sm:$0xff] (!%p432_p12)  ;;  %vm497_vm1 = vcmask (!%p432_p12), 261120   ;;  %vm600_vm2 = vcmask (!%p432_p12), 523264  }
  0x2e   : > { %v575_v40 = vld [vmem:[%s2451_s3 + $0x18] sm:$0xff] (!%p432_p12)  ;;  %v1368_v41 = vpack.c.bf16 (!%p432_p12), %v489_v37, %v488_v34  ;;  %v574_v44 = vld [vmem:[%s2451_s3 + $0x10] sm:$0xff] (!%p432_p12)  ;;  %v577_v45 = vld [vmem:[%s2451_s3 + $0x28] sm:$0xff] (!%p432_p12)  ;;  %s1864_s20 = sand.u32 (!%p432_p12), 1, %s1607_s28   ;;  %s1345_s26 = sshll.u32 (!%p432_p12), %s1691_s9, 8 }
  0x2f   : > { %1366 = vmatpush3.bf16.msra.mxu1 (!%p432_p12), %v1365_v36  ;;  %v1370_v42 = vpack.c.bf16 (!%p432_p12), %v575_v40, %v573_v39  ;;  %v579_v46 = vld [vmem:[%s2451_s3 + $0x38] sm:$0xff] (!%p432_p12)  ;;  %v485_v47 = vld [vmem:[%s2448_s0] sm:$0xff] (!%p432_p12)  ;;  %v1372_v48 = vpack.c.bf16 (!%p432_p12), %v574_v44, %v572_v43  ;;  %v578_v51 = vld [vmem:[%s2451_s3 + $0x30] sm:$0xff] (!%p432_p12)  ;;  %s1326_s21 = sshll.u32 (!%p432_p12), %s1864_s20, 8  ;;  %s1327_s25 = sshll.u32 (!%p432_p12), %s1864_s20, 4 }
  0x30   : > { %1367 = vmatprep.subr.bf16.mxu1 (!%p432_p12), %v1617_v35  ;;  %v1374_v49 = vpack.c.bf16 (!%p432_p12), %v579_v46, %v577_v45  ;;  %v576_v50 = vld [vmem:[%s2451_s3 + $0x20] sm:$0xff] (!%p432_p12)  ;;  %v581_v52 = vld [vmem:[%s2451_s3 + $0x48] sm:$0xff] (!%p432_p12)  ;;  %v583_v53 = vld [vmem:[%s2451_s3 + $0x58] sm:$0xff] (!%p432_p12)  ;;  %s1867_s22 = scalar_lea.vmem (!%p432_p12), [#allocation2], %s1326_s21  ;;  %v1620_v35 = vmov (!%p432_p12), 1935823168   ;;  %s2313_s19 = scalar_lea.hbm (!%p432_p12), %s2454_s6, %s1345_s26 }
  0x31   : > { %v1376_v54 = vpack.c.bf16 (!%p432_p12), %v578_v51, %v576_v50  ;;  %v1378_v55 = vpack.c.bf16 (!%p432_p12), %v583_v53, %v581_v52  ;;  %v580_v56 = vld [vmem:[%s2451_s3 + $0x40] sm:$0xff] (!%p432_p12)  ;;  %v582_v57 = vld [vmem:[%s2451_s3 + $0x50] sm:$0xff] (!%p432_p12)  ;;  %v585_v59 = vld [vmem:[%s2451_s3 + $0x68] sm:$0xff] (!%p432_p12)  ;;  %s466_s12 = scalar_lea.vmem (!%p432_p12), [#allocation3], %s1327_s25  ;;  %s1141_s21 = scalar_lea.sflag (!%p432_p12), [#allocation4], %s1864_s20 }
  0x32   : > { %v1380_v58 = vpack.c.bf16 (!%p432_p12), %v582_v57, %v580_v56  ;;  %v587_v60 = vld [vmem:[%s2451_s3 + $0x78] sm:$0xff] (!%p432_p12)  ;;  %v584_v62 = vld [vmem:[%s2451_s3 + $0x60] sm:$0xff] (!%p432_p12)  ;;  %v586_v63 = vld [vmem:[%s2451_s3 + $0x70] sm:$0xff] (!%p432_p12)  ;;  %s1165_s13 = sshll.u32 (!%p432_p12), %s466_s12, 4  ;;  %s1621_s23 = smov (!%p432_p12), [#allocation3]   ;;  %s2315_s13 = int_to_ptr.vmem [resolvable:$true] %s1165_s13 }
  0x33   : > { %1369 = vmatpush3.bf16.msra.mxu1 (!%p432_p12), %v1368_v41  ;;  %v1382_v61 = vpack.c.bf16 (!%p432_p12), %v587_v60, %v585_v59  ;;  %v1384_v0 = vpack.c.bf16 (!%p432_p12), %v586_v63, %v584_v62  ;;  %v1330_v1 = vld [vmem:[%s2450_s2] ss:$0 sm:$0xff] (!%p432_p12)  ;;  %v1873_v7 = vld [vmem:[%s1867_s22 + $0x8] sm:$0xff] (!%p432_p12)  ;;  %v1876_v8 = vld [vmem:[%s1867_s22 + $0x10] sm:$0xff] (!%p432_p12)  ;;  %s1449_s24 = sshll.u32 (!%p432_p12), %s1621_s23, 4  ;;  %s1450_s24 = int_to_ptr.vmem [resolvable:$false] %s1449_s24 }
  0x34   : > { %1371 = vmatprep.subr.bf16.mxu1 %v1370_v42  ;;  %v1870_v6 = vld [vmem:[%s1867_s22] sm:$0xff]  ;;  %v721_v10 = vunpack.c.h.bf16 %v1873_v7  ;;  %v1881_v11 = vld [vmem:[%s1867_s22 + $0x18] sm:$0xff]  ;;  %v723_v12 = vunpack.c.h.bf16 %v1876_v8  ;;  %v1889_v15 = vld [vmem:[%s1867_s22 + $0x28] sm:$0xff]  ;;  %v720_v31 = vunpack.c.l.bf16 %v1873_v7  ;;  %v722_v34 = vunpack.c.l.bf16 %v1876_v8  ;;  %s1451_s25 = scalar_lea.vmem %s1450_s24, 512  ;;  %p1452_p2 = scmp.lt.s32.totalorder %s2315_s13, %s1450_s24 }
  0x35   : > { %v719_v9 = vunpack.c.h.bf16 %v1870_v6  ;;  %v1885_v13 = vld [vmem:[%s1867_s22 + $0x20] sm:$0xff]  ;;  %v725_v14 = vunpack.c.h.bf16 %v1881_v11  ;;  %v1893_v17 = vld [vmem:[%s1867_s22 + $0x30] sm:$0xff]  ;;  %v729_v18 = vunpack.c.h.bf16 %v1889_v15  ;;  %1553 = vmul.bf16.f32.vacc0 %v1870_v6, %v1870_v6  ;;  %v1901_v19 = vld [vmem:[%s1867_s22 + $0x38] sm:$0xff] }
  0x36   : > { %1362 = vmatmul.mubr.msk.f32.vlgmr.msra.gmra.mrb[0].mxu1 %vm497_vm1, %v485_v47  ;;  %v727_v16 = vunpack.c.h.bf16 %v1885_v13  ;;  %1554 = vmac.bf16.f32.vacc0 %v1873_v7, %v1873_v7  ;;  %v731_v20 = vunpack.c.h.bf16 %v1893_v17  ;;  %v1907_v21 = vld [vmem:[%s1867_s22 + $0x40] sm:$0xff]  ;;  %v1913_v23 = vld [vmem:[%s1867_s22 + $0x48] sm:$0xff]  ;;  %v1916_v24 = vld [vmem:[%s1867_s22 + $0x50] sm:$0xff]  ;;  %v718_v30 = vunpack.c.l.bf16 %v1870_v6 }
  0x37   : > { %1373 = vmatpush1.bf16.msra.mxu1 %v1372_v48  ;;  %668 = vmatprep.mubr.f32.mxu1 %v1619_v38  ;;  %1555 = vmac.bf16.f32.vacc0 %v1876_v8, %v1876_v8  ;;  %v1925_v27 = vld [vmem:[%s1867_s22 + $0x58] sm:$0xff]  ;;  %v1929_v29 = vld [vmem:[%s1867_s22 + $0x60] sm:$0xff]  ;;  %v1936_v32 = vld [vmem:[%s1867_s22 + $0x68] sm:$0xff]  ;;  %v724_v37 = vunpack.c.l.bf16 %v1881_v11  ;;  %v726_v40 = vunpack.c.l.bf16 %v1885_v13  ;;  %v728_v43 = vunpack.c.l.bf16 %v1889_v15 }
  0x38   : > { %1375 = vmatprep.subr.bf16.mxu1 %v1374_v49  ;;  %1556 = vmac.bf16.f32.vacc0 %v1881_v11, %v1881_v11  ;;  %v1944_v36 = vld [vmem:[%s1867_s22 + $0x70] sm:$0xff]  ;;  %v1951_v39 = vld [vmem:[%s1867_s22 + $0x78] sm:$0xff]  ;;  %v1958_v42 = vld [vmem:[%s1867_s22 + $0x80] sm:$0xff] }
  0x39   : > { %1557 = vmac.bf16.f32.vacc0 %v1885_v13, %v1885_v13  ;;  %v1965_v45 = vld [vmem:[%s1867_s22 + $0x88] sm:$0xff]  ;;  %v1972_v48 = vld [vmem:[%s1867_s22 + $0x90] sm:$0xff]  ;;  %v1979_v51 = vld [vmem:[%s1867_s22 + $0x98] sm:$0xff]  ;;  %v2463_v13 = vunpack.c.l.bf16 %v1893_v17 }
  0x3a   : > { %1558 = vmac.bf16.f32.vacc0 %v1889_v15, %v1889_v15  ;;  %v1993_v57 = vld [vmem:[%s1867_s22 + $0xa8] sm:$0xff]  ;;  %v2000_v60 = vld [vmem:[%s1867_s22 + $0xb0] sm:$0xff]  ;;  %v2007_v63 = vld [vmem:[%s1867_s22 + $0xb8] sm:$0xff]  ;;  %v2464_v15 = vunpack.c.l.bf16 %v1901_v19 }
  0x3b   : > { %1377 = vmatpush1.bf16.msra.mxu1 %v1376_v54  ;;  %1559 = vmac.bf16.f32.vacc0 %v1893_v17, %v1893_v17  ;;  %v1986_v54 = vld [vmem:[%s1867_s22 + $0xa0] sm:$0xff]  ;;  %v2028_v59 = vld [vmem:[%s1867_s22 + $0xd0] sm:$0xff]  ;;  %v2035_v53 = vld [vmem:[%s1867_s22 + $0xd8] sm:$0xff]  ;;  %v2467_v17 = vunpack.c.l.bf16 %v1907_v21 }
  0x3c   : > { %1379 = vmatprep.subr.bf16.mxu1 %v1378_v55  ;;  %1560 = vmac.bf16.f32.vacc0 %v1901_v19, %v1901_v19  ;;  %v2042_v47 = vld [vmem:[%s1867_s22 + $0xe0] sm:$0xff]  ;;  %v2056_v41 = vld [vmem:[%s1867_s22 + $0xf0] sm:$0xff]  ;;  %v772_v26 = vunpack.c.l.bf16 %v2035_v53 }
  0x3d   : > { %1561 = vmac.bf16.f32.vacc0 %v1907_v21, %v1907_v21  ;;  %v774_v49 = vunpack.c.l.bf16 %v2042_v47 }
  0x3e   : > { %1562 = vmac.bf16.f32.vacc0 %v1913_v23, %v1913_v23 }
  0x3f   : > { %1381 = vmatpush1.bf16.msra.mxu1 %v1380_v58  ;;  %1563 = vmac.bf16.f32.vacc0 %v1916_v24, %v1916_v24  ;;  %v2457_v58 = vlaneseq }
  0x40   : > { %1383 = vmatprep.subr.bf16.mxu1 %v1382_v61  ;;  %1564 = vmac.bf16.f32.vacc0 %v1925_v27, %v1925_v27  ;;  %v1589_v61 = vunpack.c.l.s4 %v1620_v35 }
  0x41   : > { %1565 = vmac.bf16.f32.vacc0 %v1929_v29, %v1929_v29  ;;  %v2088_v33 = vshrl.u32 %v2457_v58, 7 }
  0x42   : > { %1566 = vmac.bf16.f32.vacc0 %v1936_v32, %v1936_v32 }
  0x43   : > { %1385 = vmatpush1.bf16.msra.mxu1 %v1384_v0  ;;  %1567 = vmac.bf16.f32.vacc0 %v1944_v36, %v1944_v36 }
  0x44   : > { %1568 = vmac.bf16.f32.vacc0 %v1951_v39, %v1951_v39 }
  0x45   : > { %1569 = vmac.bf16.f32.vacc0 %v1958_v42, %v1958_v42 }
  0x46   : > { %1570 = vmac.bf16.f32.vacc0 %v1965_v45, %v1965_v45 }
  0x47   : > { %1571 = vmac.bf16.f32.vacc0 %v1972_v48, %v1972_v48 }
  0x48   : > { %1572 = vmac.bf16.f32.vacc0 %v1979_v51, %v1979_v51 }
  0x49   : > { %1573 = vmac.bf16.f32.vacc0 %v1986_v54, %v1986_v54 }
  0x4a   : > { %1574 = vmac.bf16.f32.vacc0 %v1993_v57, %v1993_v57 }
  0x4b   : > { %1575 = vmac.bf16.f32.vacc0 %v2000_v60, %v2000_v60 }
  0x4c   : > { %1576 = vmac.bf16.f32.vacc0 %v2007_v63, %v2007_v63 }
 0x109   : > { %v567_v2 = vpop.f32.mrb[0].mxu1 }
 0x10a   : > { %v568_v3 = vadd.f32 %v1330_v1, %v567_v2  ;;  %v1363_v4 = vpop.f32.mrb[1].mxu1  ;;  %v2014_v2 = vld [vmem:[%s1867_s22 + $0xc0] sm:$0xff]  ;;  %v1590_v1 = vunpack.c.0.s8 %v1589_v61 }
 0x10b   : > { %v2049_v4 = vld [vmem:[%s1867_s22 + $0xe8] sm:$0xff]  ;;  %1577 = vmac.bf16.f32.vacc0 %v2014_v2, %v2014_v2 }
 0x10c   : > { %v571_v5 = vmax.f32 %v568_v3, 0.0  ;;  %v2063_v3 = vld [vmem:[%s1867_s22 + $0xf8] sm:$0xff]  ;;  %v1593_v44 = vsub.s32 %v1590_v1, %v2088_v33  ;;  %v776_v35 = vunpack.c.l.bf16 %v2049_v4 }
 0x10e   : > { %1332 = vmatmul.mubr.msk.f32.vlgmr.msra.gmra.mrb[2].mxu1 %vm600_vm2, %v571_v5  ;;  %v2021_v5 = vld [vmem:[%s1867_s22 + $0xc8] sm:$0xff]  ;;  %s1445_s22 = scalar_lea.vmem %s2315_s13, 256 }
 0x10f   : > { %1578 = vmac.bf16.f32.vacc0 %v2021_v5, %v2021_v5  ;;  %p1446_p13 = scmp.ne.s32.totalorder %s2315_s13, %s1445_s22  ;;  %p1453_p3 = scmp.lt.s32.totalorder %s1451_s25, %s1445_s22 }
 0x110   : > { %1579 = vmac.bf16.f32.vacc0 %v2028_v59, %v2028_v59 }
 0x111   : > { %1580 = vmac.bf16.f32.vacc0 %v2035_v53, %v2035_v53  ;;  %p1447_p0 = pnand %p1446_p13, %p1709_p6  ;;  %p1454_p4 = por %p1453_p3, %p1452_p2 }
 0x112   : > { %1581 = vmac.bf16.f32.vacc0 %v2042_v47, %v2042_v47 }
 0x113   : > { %1582 = vmac.bf16.f32.vacc0 %v2049_v4, %v2049_v4  ;;  %p1448_p1 = pneg %p1447_p0 }
 0x114   : > { %1583 = vmac.bf16.f32.vacc0 %v2056_v41, %v2056_v41 }
 0x115   : > { %1584 = vmac.bf16.f32.vacc0 %v2063_v3, %v2063_v3  ;;  %p1455_p5 = pnand %p1454_p4, %p1448_p1 }
 0x117   : > { %v1585_v50 = vmovacc.add.low.vacc0 }
 0x118   : > { %v1586_v62 = vmovacc.add.high.vacc0 }
 0x11a   : > { %v1587_v56 = vcombine.low %v1585_v50, %v1586_v62  ;;  %v1588_v38 = vcombine.high %v1585_v50, %v1586_v62 }
 0x11c   : > { %v1594_v28 = vrot.slane %v1587_v56, %v1593_v44  ;;  %v1600_v55 = vrot.slane %v1588_v38, %v1593_v44 }
 0x11e   : > { %v914_v52 = vrot.slane %v1600_v55, 4  ;;  %v877_v38 = vrot.slane %v1594_v28, 4 }
 0x120   : > { %v915_v25 = vadd.f32 %v1600_v55, %v914_v52  ;;  %v878_v44 = vadd.f32 %v1594_v28, %v877_v38  ;;  %v588_v28 = vld [vmem:[%s2452_s4] sm:$0x3] }
 0x122   : > { %v916_v50 = vrot.slane %v915_v25, 2  ;;  %v879_v0 = vrot.slane %v878_v44, 2 }
 0x124   : > { %v917_v61 = vadd.f32 %v916_v50, %v915_v25  ;;  %v880_v52 = vadd.f32 %v879_v0, %v878_v44  ;;  %v596_v0 = vsub.s32 1, %v2088_v33 }
 0x126   : > { %v918_v58 = vrot.slane %v917_v61, 1  ;;  %v881_v50 = vrot.slane %v880_v52, 1 }
 0x128   : > { %v919_v1 = vadd.f32 %v918_v58, %v917_v61  ;;  %v882_v46 = vadd.f32 %v881_v50, %v880_v52  ;;  %v592_v61 = vsub.s32 0, %v2088_v33 }
 0x12a   : > { %v921_v56 = vmax.f32 %v919_v1, 1e-24  ;;  %v920_v58 = vmax.f32 %v882_v46, 1e-24  ;;  %v593_v1 = vrot.slane %v588_v28, %v592_v61 }
 0x12c   : > { %1439 = vrsqrt.f32 %v921_v56 }
 0x12d   : > { %1441 = vrsqrt.f32 %v920_v58 }
 0x136   : > { %v2097_v22 = vpop.eup %1439 }
 0x137   : > { %v925_v55 = vmul.f32 %v2097_v22, %v719_v9  ;;  %v927_v25 = vmul.f32 %v2097_v22, %v721_v10  ;;  %v597_v9 = vrot.slane %v588_v28, %v596_v0  ;;  %v929_v10 = vmul.f32 %v2097_v22, %v723_v12  ;;  %v2116_v52 = vpop.eup %1441 }
 0x138   : > { %v931_v46 = vmul.f32 %v2097_v22, %v725_v14  ;;  %v924_v58 = vmul.f32 %v2116_v52, %v718_v30  ;;  %v926_v12 = vmul.f32 %v2116_v52, %v720_v31  ;;  %v928_v14 = vmul.f32 %v2116_v52, %v722_v34 }
 0x139   : > { %v991_v62 = vpack.c.bf16 %v927_v25, %v925_v55  ;;  %v933_v25 = vmul.f32 %v2097_v22, %v727_v16  ;;  %v930_v16 = vmul.f32 %v2116_v52, %v724_v37  ;;  %v935_v6 = vmul.f32 %v2097_v22, %v729_v18 }
 0x13a   : > { %v993_v28 = vpack.c.bf16 %v931_v46, %v929_v10  ;;  %v990_v30 = vpack.c.bf16 %v926_v12, %v924_v58  ;;  %v932_v34 = vmul.f32 %v2116_v52, %v726_v40  ;;  %v934_v11 = vmul.f32 %v2116_v52, %v728_v43 }
 0x13b   : > { %1022 = vmatprep.subr.bf16.mxu0 %v991_v62  ;;  %v992_v8 = vpack.c.bf16 %v930_v16, %v928_v14  ;;  %v995_v37 = vpack.c.bf16 %v935_v6, %v933_v25  ;;  %v937_v18 = vmul.f32 %v2097_v22, %v731_v20  ;;  %v2462_v0 = vunpack.c.h.bf16 %v1901_v19 }
 0x13c   : > { %1023 = vmatpush1.bf16.msra.mxu0 %v990_v30  ;;  %v936_v40 = vmul.f32 %v2116_v52, %v2463_v13  ;;  %v938_v43 = vmul.f32 %v2116_v52, %v2464_v15  ;;  %v2468_v19 = vunpack.c.l.bf16 %v1913_v23  ;;  %v2469_v12 = vunpack.c.h.bf16 %v1916_v24 }
 0x13d   : > { %1024 = vmatprep.subr.bf16.mxu0 %v993_v28 }
 0x13e   : > { %v996_v46 = vpack.c.bf16 %v938_v43, %v936_v40  ;;  %v942_v25 = vmul.f32 %v2116_v52, %v2468_v19  ;;  %v945_v14 = vmul.f32 %v2097_v22, %v2469_v12  ;;  %v2478_v40 = vunpack.c.h.bf16 %v1951_v39 }
 0x13f   : > { %v2485_v12 = vunpack.c.h.bf16 %v1972_v48 }
 0x140   : > { %1025 = vmatpush1.bf16.msra.mxu0 %v992_v8  ;;  %v955_v15 = vmul.f32 %v2097_v22, %v2478_v40 }
 0x141   : > { %1026 = vmatprep.subr.bf16.mxu0 %v995_v37 }
 0x1e1   : > { %v670_v56 = vpop.f32.mrb[2].mxu1 }
 0x1e2   : > { %v671_v38 = vadd.f32 %v670_v56, %v593_v1  ;;  %v672_v44 = vpop.f32.mrb[3].mxu1  ;;  %v939_v1 = vmul.f32 %v2097_v22, %v2462_v0 }
 0x1e3   : > { %v673_v62 = vadd.f32 %v672_v44, %v597_v9  ;;  %v994_v9 = vpack.c.bf16 %v934_v11, %v932_v34  ;;  %v2466_v44 = vunpack.c.h.bf16 %v1913_v23  ;;  %v2472_v23 = vunpack.c.l.bf16 %v1925_v27 }
 0x1e4   : > { %v2118_v55 = vmax.f32 %v671_v38, 0.0  ;;  %v997_v56 = vpack.c.bf16 %v939_v1, %v937_v18  ;;  %v2465_v38 = vunpack.c.h.bf16 %v1907_v21  ;;  %v2471_v21 = vunpack.c.l.bf16 %v1916_v24 }
 0x1e5   : > { %v2123_v50 = vmax.f32 %v673_v62, 0.0  ;;  %v943_v10 = vmul.f32 %v2097_v22, %v2466_v44  ;;  %1027 = vmatpush1.bf16.msra.mxu0 %v994_v9  ;;  %v940_v62 = vmul.f32 %v2116_v52, %v2467_v17  ;;  %v2474_v34 = vunpack.c.h.bf16 %v1936_v32 }
 0x1e6   : > { %v677_v61 = vmul.f32 %v2118_v55, %v2118_v55  ;;  %v941_v20 = vmul.f32 %v2097_v22, %v2465_v38  ;;  %1028 = vmatprep.subr.bf16.mxu0 %v997_v56  ;;  %v944_v6 = vmul.f32 %v2116_v52, %v2471_v21  ;;  %v2475_v24 = vunpack.c.l.bf16 %v1929_v29 }
 0x1e7   : > { %v678_v7 = vmul.f32 %v2123_v50, %v2123_v50  ;;  %v998_v16 = vpack.c.bf16 %v942_v25, %v940_v62  ;;  %v951_v11 = vmul.f32 %v2097_v22, %v2474_v34  ;;  %v2477_v9 = vunpack.c.h.bf16 %v1944_v36 }
 0x1e8   : > { %v999_v58 = vpack.c.bf16 %v943_v10, %v941_v20  ;;  %v948_v18 = vmul.f32 %v2116_v52, %v2475_v24  ;;  %v2481_v44 = vunpack.c.h.bf16 %v1958_v42 }
 0x1e9   : > { %v679_v31 = vadd.f32 %v678_v7, %v677_v61  ;;  %v2470_v61 = vunpack.c.h.bf16 %v1925_v27  ;;  %1029 = vmatpush1.bf16.msra.mxu0 %v996_v46  ;;  %v946_v7 = vmul.f32 %v2116_v52, %v2472_v23  ;;  %v2476_v27 = vunpack.c.l.bf16 %v1936_v32 }
 0x1ea   : > { %1030 = vmatprep.subr.bf16.mxu0 %v999_v58  ;;  %v953_v13 = vmul.f32 %v2097_v22, %v2477_v9  ;;  %v2480_v32 = vunpack.c.l.bf16 %v1951_v39  ;;  %v957_v10 = vmul.f32 %v2097_v22, %v2481_v44  ;;  %v2482_v46 = vunpack.c.h.bf16 %v1965_v45 }
 0x1eb   : > { %680 = vadd.xlane.f32.xlu0 %v679_v31  ;;  %v947_v28 = vmul.f32 %v2097_v22, %v2470_v61  ;;  %v2473_v31 = vunpack.c.h.bf16 %v1929_v29  ;;  %v1000_v37 = vpack.c.bf16 %v946_v7, %v944_v6  ;;  %v950_v0 = vmul.f32 %v2116_v52, %v2476_v27 }
 0x1ec   : > { %v2479_v29 = vunpack.c.l.bf16 %v1944_v36  ;;  %v954_v38 = vmul.f32 %v2116_v52, %v2480_v32  ;;  %v1005_v20 = vpack.c.bf16 %v955_v15, %v953_v13  ;;  %v959_v17 = vmul.f32 %v2097_v22, %v2482_v46 }
 0x1ed   : > { %v1001_v30 = vpack.c.bf16 %v947_v28, %v945_v14  ;;  %v949_v8 = vmul.f32 %v2097_v22, %v2473_v31  ;;  %1031 = vmatpush1.bf16.msra.mxu0 %v998_v16  ;;  %v1002_v43 = vpack.c.bf16 %v950_v0, %v948_v18  ;;  %v2483_v36 = vunpack.c.l.bf16 %v1958_v42 }
 0x1ee   : > { %v952_v56 = vmul.f32 %v2116_v52, %v2479_v29  ;;  %v2484_v39 = vunpack.c.l.bf16 %v1965_v45  ;;  %v1007_v58 = vpack.c.bf16 %v959_v17, %v957_v10  ;;  %v961_v14 = vmul.f32 %v2097_v22, %v2485_v12 }
 0x1ef   : > { %1032 = vmatprep.subr.bf16.mxu0 %v1001_v30  ;;  %v1003_v1 = vpack.c.bf16 %v951_v11, %v949_v8  ;;  %v956_v19 = vmul.f32 %v2116_v52, %v2483_v36  ;;  %v2486_v61 = vunpack.c.h.bf16 %v1979_v51  ;;  %v2487_v42 = vunpack.c.l.bf16 %v1972_v48 }
 0x1f0   : > { %v1004_v62 = vpack.c.bf16 %v954_v38, %v952_v56  ;;  %v958_v25 = vmul.f32 %v2116_v52, %v2484_v39  ;;  %v2488_v45 = vunpack.c.l.bf16 %v1979_v51  ;;  %v2489_v7 = vunpack.c.h.bf16 %v1986_v54 }
 0x1f1   : > { %1033 = vmatpush1.bf16.msra.mxu0 %v1000_v37  ;;  %v963_v28 = vmul.f32 %v2097_v22, %v2486_v61  ;;  %v960_v21 = vmul.f32 %v2116_v52, %v2487_v42  ;;  %v2490_v31 = vunpack.c.h.bf16 %v1993_v57  ;;  %v2491_v48 = vunpack.c.l.bf16 %v1986_v54 }
 0x1f2   : > { %1034 = vmatprep.subr.bf16.mxu0 %v1003_v1  ;;  %v1006_v16 = vpack.c.bf16 %v958_v25, %v956_v19  ;;  %v962_v6 = vmul.f32 %v2116_v52, %v2488_v45  ;;  %v965_v30 = vmul.f32 %v2097_v22, %v2489_v7  ;;  %v2492_v51 = vunpack.c.l.bf16 %v1993_v57 }
 0x1f3   : > { %v1009_v23 = vpack.c.bf16 %v963_v28, %v961_v14  ;;  %v967_v8 = vmul.f32 %v2097_v22, %v2490_v31  ;;  %v964_v11 = vmul.f32 %v2116_v52, %v2491_v48  ;;  %v2493_v18 = vunpack.c.h.bf16 %v2000_v60 }
 0x1f4   : > { %v1008_v34 = vpack.c.bf16 %v962_v6, %v960_v21  ;;  %v966_v37 = vmul.f32 %v2116_v52, %v2492_v51  ;;  %v2494_v0 = vunpack.c.h.bf16 %v2007_v63  ;;  %v2495_v54 = vunpack.c.l.bf16 %v2000_v60 }
 0x1f5   : > { %1035 = vmatpush1.bf16.msra.mxu0 %v1002_v43  ;;  %v1011_v24 = vpack.c.bf16 %v967_v8, %v965_v30  ;;  %v969_v27 = vmul.f32 %v2097_v22, %v2493_v18  ;;  %v2496_v57 = vunpack.c.l.bf16 %v2007_v63  ;;  %v2497_v43 = vunpack.c.h.bf16 %v2014_v2 }
 0x1f6   : > { %1036 = vmatprep.subr.bf16.mxu0 %v1005_v20  ;;  %v971_v1 = vmul.f32 %v2097_v22, %v2494_v0  ;;  %v1010_v9 = vpack.c.bf16 %v966_v37, %v964_v11  ;;  %v968_v13 = vmul.f32 %v2116_v52, %v2495_v54  ;;  %v2498_v56 = vunpack.c.h.bf16 %v2021_v5 }
 0x1f7   : > { %v970_v40 = vmul.f32 %v2116_v52, %v2496_v57  ;;  %v973_v29 = vmul.f32 %v2097_v22, %v2497_v43  ;;  %v2499_v60 = vunpack.c.l.bf16 %v2014_v2  ;;  %v2500_v63 = vunpack.c.l.bf16 %v2021_v5 }
 0x1f8   : > { %v1013_v15 = vpack.c.bf16 %v971_v1, %v969_v27  ;;  %v975_v32 = vmul.f32 %v2097_v22, %v2498_v56  ;;  %v2501_v46 = vunpack.c.h.bf16 %v2028_v59  ;;  %v2503_v2 = vunpack.c.l.bf16 %v2028_v59 }
 0x1f9   : > { %1037 = vmatpush1.bf16.msra.mxu0 %v1004_v62  ;;  %v1012_v38 = vpack.c.bf16 %v970_v40, %v968_v13  ;;  %v972_v20 = vmul.f32 %v2116_v52, %v2499_v60  ;;  %v974_v44 = vmul.f32 %v2116_v52, %v2500_v63  ;;  %v2502_v62 = vunpack.c.h.bf16 %v2035_v53 }
 0x1fa   : > { %1038 = vmatprep.subr.bf16.mxu0 %v1007_v58  ;;  %v1015_v10 = vpack.c.bf16 %v975_v32, %v973_v29  ;;  %v977_v17 = vmul.f32 %v2097_v22, %v2501_v46  ;;  %v976_v39 = vmul.f32 %v2116_v52, %v2503_v2  ;;  %v978_v5 = vmul.f32 %v2116_v52, %v772_v26 }
 0x1fb   : > { %v979_v36 = vmul.f32 %v2097_v22, %v2502_v62  ;;  %v1014_v19 = vpack.c.bf16 %v974_v44, %v972_v20  ;;  %v2504_v58 = vunpack.c.h.bf16 %v2042_v47  ;;  %v2505_v14 = vunpack.c.h.bf16 %v2049_v4 }
 0x1fc   : > { %v1016_v28 = vpack.c.bf16 %v978_v5, %v976_v39  ;;  %v980_v59 = vmul.f32 %v2116_v52, %v774_v49  ;;  %v982_v26 = vmul.f32 %v2116_v52, %v776_v35  ;;  %v2507_v21 = vunpack.c.h.bf16 %v2063_v3 }
 0x1fd   : > { %1039 = vmatpush1.bf16.msra.mxu0 %v1006_v16  ;;  %v1017_v25 = vpack.c.bf16 %v979_v36, %v977_v17  ;;  %v981_v12 = vmul.f32 %v2097_v22, %v2504_v58  ;;  %v983_v61 = vmul.f32 %v2097_v22, %v2505_v14  ;;  %v2506_v16 = vunpack.c.h.bf16 %v2056_v41 }
 0x1fe   : > { %1040 = vmatprep.subr.bf16.mxu0 %v1009_v23  ;;  %v987_v45 = vmul.f32 %v2097_v22, %v2507_v21  ;;  %v1018_v6 = vpack.c.bf16 %v982_v26, %v980_v59  ;;  %v2508_v47 = vunpack.c.l.bf16 %v2056_v41  ;;  %v2509_v4 = vunpack.c.l.bf16 %v2063_v3 }
 0x1ff   : > { %v1019_v53 = vpack.c.bf16 %v983_v61, %v981_v12  ;;  %v985_v42 = vmul.f32 %v2097_v22, %v2506_v16 }
 0x200   : > { %v984_v49 = vmul.f32 %v2116_v52, %v2508_v47  ;;  %v986_v35 = vmul.f32 %v2116_v52, %v2509_v4 }
 0x201   : > { %1041 = vmatpush1.bf16.msra.mxu0 %v1008_v34  ;;  %v1021_v23 = vpack.c.bf16 %v987_v45, %v985_v42 }
 0x202   : > { %1042 = vmatprep.subr.bf16.mxu0 %v1011_v24  ;;  %v1020_v7 = vpack.c.bf16 %v986_v35, %v984_v49 }
 0x205   : > { %1043 = vmatpush1.bf16.msra.mxu0 %v1010_v9 }
 0x206   : > { %1044 = vmatprep.subr.bf16.mxu0 %v1013_v15 }
 0x209   : > { %1045 = vmatpush1.bf16.msra.mxu0 %v1012_v38 }
 0x20a   : > { %1046 = vmatprep.subr.bf16.mxu0 %v1015_v10 }
 0x20d   : > { %1047 = vmatpush1.bf16.msra.mxu0 %v1014_v19 }
 0x20e   : > { %1048 = vmatprep.subr.bf16.mxu0 %v1017_v25 }
 0x211   : > { %1049 = vmatpush1.bf16.msra.mxu0 %v1016_v28 }
 0x212   : > { %1050 = vmatprep.subr.bf16.mxu0 %v1019_v53 }
 0x215   : > { %1051 = vmatpush1.bf16.msra.mxu0 %v1018_v6 }
 0x216   : > { %1052 = vmatprep.subr.bf16.mxu0 %v1021_v23 }
 0x219   : > { %1053 = vmatpush1.bf16.msra.mxu0 %v1020_v7 }
 0x278   : > { %v681_v30 = vpop.xlane.xlu0 %680 }
 0x279   : > { %v682_v22 = vmax.f32 %v681_v30, 1e-24 }
 0x27b   : > { %1443 = vrsqrt.f32 %v682_v22 }
 0x285   : > { %v1444_v31 = vpop.eup %1443 }
 0x286   : > { %v685_v41 = vmul.f32 %v1444_v31, %v2123_v50  ;;  %v684_v8 = vmul.f32 %v1444_v31, %v2118_v55 }
 0x288   : > { %v989_v34 = vpack.c.bf16 %v685_v41, %v685_v41  ;;  %v988_v3 = vpack.c.bf16 %v684_v8, %v684_v8 }
 0x28a   : > { %1054 = vmatprep.mubr.bf16.mxu0 %v989_v34 }
 0x28b   : > { %1055 = vmatmul.mubr.bf16.vlgmr.msra.gmra.mrb[0].mxu0 %v988_v3 }
 0x35e   : > { %v1056_v52 = vpop.f32.mrb[0].mxu0 }
 0x35f   : > { %v1065_v55 = vrot.slane %v1056_v52, 4  ;;  %v1058_v50 = vpop.f32.mrb[1].mxu0  ;;  %1063 = vst [vmem:[%s466_s12] sm:$0xff] %v1056_v52 }
 0x360   : > { %v1071_v48 = vrot.slane %v1058_v50, 4  ;;  %v1060_v11 = vpop.f32.mrb[2].mxu0  ;;  %1064 = vst [vmem:[%s466_s12 + $0x8] sm:$0xff] %v1058_v50 }
 0x361   : > { %v1066_v51 = vmax.f32 %v1056_v52, %v1065_v55  ;;  %v1061_v37 = vpop.f32.mrb[3].mxu0 }
 0x362   : > { %1458 = shalt.err (!%p1455_p5)
}
 0x363   : > { %s1459_s26 = scalar_lea.hbm %s2313_s19, 256  ;;  %s1463_s18 = scalar_lea.hbm %s2454_s6, 512 }
 0x364   : > { %p1460_p7 = scmp.ne.s32.totalorder %s2313_s19, %s1459_s26  ;;  %p1464_p12 = scmp.lt.u32.totalorder %s2313_s19, %s2454_s6 }
 0x365   : > { %p1465_p13 = scmp.lt.u32.totalorder %s1463_s18, %s1459_s26  ;;  %p1467_p1 = scmp.lt.u32.totalorder %s1459_s26, %s2313_s19 }
 0x366   : > { %p1461_p10 = pnand %p1460_p7, %p1709_p6 }
 0x367   : > { %p1466_p0 = por %p1465_p13, %p1464_p12 }
 0x368   : > { %p1462_p11 = pneg %p1461_p10 }
 0x369   : > { %p1468_p2 = por %p1467_p1, %p1466_p0 }
 0x36b   : > { %p1469_p3 = pnand %p1468_p2, %p1462_p11 }
 0x36d   : > { %1472 = shalt.err (!%p1469_p3)
}
 0x36e   : > { %1386 = dma.vmem_to_hbm [thread:$0]  (%p1709_p6), %s2315_s13, 256, %s2313_s19, %s1141_s21   ;;  %v1072_v24 = vmax.f32 %v1058_v50, %v1071_v48  ;;  %v1622_v18 = vmov 1966171168   ;;  %v1067_v0 = vrot.slane %v1066_v51, 2  ;;  %v2510_v44 = vlaneseq }
 0x36f   : > { %v1081_v27 = vunpack.c.l.s4 %v1622_v18  ;;  %s1328_s22 = sshll.u32 %s1864_s20, 1  ;;  %s1145_s13 = sand.u32 1, %s1691_s9  }
 0x370   : > { %v1073_v1 = vrot.slane %v1072_v24, 2  ;;  %v1068_v9 = vmax.f32 %v1066_v51, %v1067_v0  ;;  %s2459_s19 = sshll.u32 %s1691_s9, 5  ;;  %s473_s21 = scalar_lea.vmem [#allocation5], %s1328_s22  ;;  %vm2351_vm6 = vcmp.lt.s32.totalorder %v2510_v44, 256 }
 0x371   : > { %v1082_v13 = vunpack.c.0.s8 %v1081_v27  ;;  %s1179_s25 = sshll.u32 %s473_s21, 4  ;;  %s2361_s17 = scalar_lea.hbm %s2455_s7, %s2459_s19  ;;  %s2363_s25 = int_to_ptr.vmem [resolvable:$true] %s1179_s25 }
 0x372   : > { %v1074_v54 = vmax.f32 %v1072_v24, %v1073_v1  ;;  %v1069_v57 = vrot.slane %v1068_v9, 1  ;;  %s2371_s18 = scalar_lea.sflag [#allocation6], %s1145_s13  ;;  %s1473_s23 = scalar_lea.vmem %s2363_s25, 32 }
 0x373   : > { %v2341_v29 = vsub.s32 %v1082_v13, %v2088_v33  ;;  %p1474_p4 = scmp.ne.s32.totalorder %s2363_s25, %s1473_s23  ;;  %s1623_s24 = smov [#allocation5]  }
 0x374   : > { %v1075_v40 = vrot.slane %v1074_v54, 1  ;;  %v1070_v15 = vmax.f32 %v1068_v9, %v1069_v57  ;;  %s1477_s26 = sshll.u32 %s1623_s24, 4  ;;  %s1478_s26 = int_to_ptr.vmem [resolvable:$false] %s1477_s26 }
 0x375   : > { %p1475_p5 = pnand %p1474_p4, %p1709_p6  ;;  %s1479_s12 = scalar_lea.vmem %s1478_s26, 64 }
 0x376   : > { %v1076_v43 = vmax.f32 %v1074_v54, %v1075_v40  ;;  %vm1102_vm3 = vcmp.ge.f32.partialorder %v1056_v52, %v1070_v15  ;;  %p1480_p10 = scmp.lt.s32.totalorder %s2363_s25, %s1478_s26  ;;  %p1481_p11 = scmp.lt.s32.totalorder %s1479_s12, %s1473_s23 }
 0x377   : > { %v1104_v56 = vsel %vm1102_vm3, %v2088_v33, 8  ;;  %p1476_p7 = pneg %p1475_p5 }
 0x378   : > { %v1079_v32 = vcombine.low %v1070_v15, %v1076_v43  ;;  %vm1103_vm4 = vcmp.ge.f32.partialorder %v1058_v50, %v1076_v43  ;;  %v1106_v38 = vrot.slane %v1104_v56, 4  ;;  %p1482_p12 = por %p1481_p11, %p1480_p10 }
 0x379   : > { %v1105_v60 = vsel %vm1103_vm4, %v2088_v33, 8 }
 0x37a   : > { %v1115_v20 = vrot.slane %v1105_v60, 4  ;;  %v1086_v63 = vrot.slane %v1079_v32, %v2341_v29  ;;  %vm1107_vm5 = vcmp.lt.s32.totalorder %v1104_v56, %v1106_v38  ;;  %p1483_p13 = pnand %p1482_p12, %p1476_p7 }
 0x37b   : > { %v1108_v46 = vsel %vm1107_vm5, %v1104_v56, %v1106_v38 }
 0x37c   : > { %vm1116_vm7 = vcmp.lt.s32.totalorder %v1105_v60, %v1115_v20  ;;  %v1093_v17 = vrot.slane %v1086_v63, %v2341_v29  ;;  %v1109_v33 = vrot.slane %v1108_v46, 2 }
 0x37d   : > { %v1117_v62 = vsel %vm1116_vm7, %v1105_v60, %v1115_v20 }
 0x37e   : > { %v1118_v36 = vrot.slane %v1117_v62, 2  ;;  %1099 = vst.msk [vmem:[%s473_s21] sm:$0x3] %vm2351_vm6, %v1093_v17  ;;  %vm2367_vm8 = vcmp.lt.s32.totalorder %v1108_v46, %v1109_v33 }
 0x37f   : > { %1486 = shalt.err (!%p1483_p13)
}
 0x380   : > { %s1487_s13 = scalar_lea.hbm %s2361_s17, 32  ;;  %s1491_s24 = scalar_lea.hbm %s2455_s7, 64 }
 0x381   : > { %p1488_p0 = scmp.ne.s32.totalorder %s2361_s17, %s1487_s13  ;;  %p1492_p3 = scmp.lt.u32.totalorder %s2361_s17, %s2455_s7 }
 0x382   : > { %p1493_p4 = scmp.lt.u32.totalorder %s1491_s24, %s1487_s13  ;;  %p1495_p7 = scmp.lt.u32.totalorder %s1487_s13, %s2361_s17 }
 0x383   : > { %p1489_p1 = pnand %p1488_p0, %p1709_p6 }
 0x384   : > { %p1494_p5 = por %p1493_p4, %p1492_p3 }
 0x385   : > { %p1490_p2 = pneg %p1489_p1 }
 0x386   : > { %p1496_p10 = por %p1495_p7, %p1494_p5 }
 0x388   : > { %p1497_p11 = pnand %p1496_p10, %p1490_p2 }
 0x38a   : > { %1500 = shalt.err (!%p1497_p11)
}
 0x38b   : > { %1387 = dma.vmem_to_hbm [thread:$0]  (%p1709_p6), %s2363_s25, 32, %s2361_s17, %s2371_s18   ;;  %v1111_v2 = vsel %vm2367_vm8, %v1108_v46, %v1109_v33  ;;  %vm1119_vm9 = vcmp.lt.s32.totalorder %v1117_v62, %v1118_v36 }
 0x38c   : > { %v1112_v39 = vrot.slane %v1111_v2, 1  ;;  %v1120_v5 = vsel %vm1119_vm9, %v1117_v62, %v1118_v36  ;;  %s480_s10 = scalar_lea.vmem [#allocation7], %s1328_s22  ;;  %s2515_s23 = sshll.u32 %s1691_s9, 5 }
 0x38d   : > { %v1121_v25 = vrot.slane %v1120_v5, 1  ;;  %s1193_s19 = sshll.u32 %s480_s10, 4  ;;  %s2405_s12 = scalar_lea.hbm %s2456_s8, %s2515_s23  ;;  %s1194_s19 = int_to_ptr.vmem [resolvable:$true] %s1193_s19 }
 0x38e   : > { %vm1113_vm10 = vcmp.lt.s32.totalorder %v1111_v2, %v1112_v39  ;;  %s1501_s13 = scalar_lea.vmem %s1194_s19, 32  ;;  %s1624_s20 = smov [#allocation7]  }
 0x38f   : > { %v1114_v58 = vsel %vm1113_vm10, %v1111_v2, %v1112_v39  ;;  %vm1122_vm11 = vcmp.lt.s32.totalorder %v1120_v5, %v1121_v25  ;;  %p1502_p12 = scmp.ne.s32.totalorder %s1194_s19, %s1501_s13  ;;  %s1505_s22 = sshll.u32 %s1624_s20, 4  ;;  %s1506_s22 = int_to_ptr.vmem [resolvable:$false] %s1505_s22 }
 0x390   : > { %v1123_v12 = vsel %vm1122_vm11, %v1120_v5, %v1121_v25  ;;  %s1507_s9 = scalar_lea.vmem %s1506_s22, 64  ;;  %p1508_p1 = scmp.lt.s32.totalorder %s1194_s19, %s1506_s22 }
 0x391   : > { %v1124_v14 = vcombine.low %v1114_v58, %v1123_v12  ;;  %p1503_p13 = pnand %p1502_p12, %p1709_p6  ;;  %p1509_p2 = scmp.lt.s32.totalorder %s1507_s9, %s1501_s13 }
 0x393   : > { %v1131_v61 = vrot.slane %v1124_v14, %v2341_v29  ;;  %p1504_p0 = pneg %p1503_p13  ;;  %p1510_p3 = por %p1509_p2, %p1508_p1 }
 0x395   : > { %v1138_v28 = vrot.slane %v1131_v61, %v2341_v29  ;;  %p1511_p4 = pnand %p1510_p3, %p1504_p0 }
 0x397   : > { %1139 = vst.msk [vmem:[%s480_s10] sm:$0x3] %vm2351_vm6, %v1138_v28 }
 0x398   : > { %1514 = shalt.err (!%p1511_p4)
}
 0x399   : > { %s1515_s21 = scalar_lea.hbm %s2405_s12, 32  ;;  %s1519_s10 = scalar_lea.hbm %s2456_s8, 64 }
 0x39a   : > { %p1516_p5 = scmp.ne.s32.totalorder %s2405_s12, %s1515_s21  ;;  %p1520_p11 = scmp.lt.u32.totalorder %s2405_s12, %s2456_s8 }
 0x39b   : > { %p1521_p12 = scmp.lt.u32.totalorder %s1519_s10, %s1515_s21  ;;  %p1523_p0 = scmp.lt.u32.totalorder %s1515_s21, %s2405_s12 }
 0x39c   : > { %p1517_p7 = pnand %p1516_p5, %p1709_p6 }
 0x39d   : > { %p1522_p13 = por %p1521_p12, %p1520_p11 }
 0x39e   : > { %p1518_p10 = pneg %p1517_p7 }
 0x39f   : > { %p1524_p1 = por %p1523_p0, %p1522_p13 }
 0x3a1   : > { %p1525_p2 = pnand %p1524_p1, %p1518_p10 }
 0x3a3   : > { %1528 = shalt.err (!%p1525_p2)
}
 0x3a4   : > { %1388 = dma.vmem_to_hbm [thread:$0]  (%p1709_p6), %s1194_s19, 32, %s2405_s12, %s2371_s18  }
 0x3a5 PF: > { %s1205_s17 = sand.u32 1, %s1603_s27   ;;  %p1393_p3 = pnand %p1321_p9, %p1715_p8 }
 0x3a6   : > { %s1206_s13 = scalar_lea.sflag [#allocation4], %s1205_s17 }
 0x3a7   : > { %1546 = dma.done.wait (!%p1393_p3), %s1206_s13, 256  }
 0x3a8   : > { %1548 = vsyncadd (!%p1393_p3), %s1206_s13, 4294967040  ;;  %s2516_s20 = sadd.s32 4294967294, %s1615_s30  }
 0x3a9   : > { %s1214_s22 = sand.u32 1, %s2516_s20  }
 0x3aa   : > { %s1215_s9 = scalar_lea.sflag [#allocation6], %s1214_s22 }
 0x3ab   : > { %1550 = dma.done.wait (!%p1393_p3), %s1215_s9, 64  }
 0x3ac   : > { %1552 = vsyncadd (!%p1393_p3), %s1215_s9, 4294967232  ;;  %p22_p6 = scmp.ge.s32.totalorder %s1695_s11, 4   ;;  %s2517_s27 = smov %s1607_s28 }
 0x3ad   : > { %s2518_s28 = smov %s1611_s29  ;;  %s2519_s29 = smov %s1707_s14 }
 0x3ae   : > { %s2520_s30 = smov %s1695_s11  ;;  %24 = sbr.rel (!%p22_p6) target bundleno = 5 (0x5), region = 154 }
 0x3b5   :  { %1229 = vsyncpa [#allocation4], 1 }
 0x3b6   :  { %1231 = vsyncpa [#allocation4 + $0x1], 1 }
 0x3b7   :  { %1232 = vsyncpa [#allocation6], 1 }
 0x3b8   :  { %1234 = vsyncpa [#allocation6 + $0x1], 1 }

</bundles_post_ra>
